<compile_context>
chip_gen: v6e
topology: v6e:2x2x1
jax: 0.10.0
libtpu: 0.0.40
codegen_flags: <defaults>
</compile_context>

<pallas_src>
from functools import partial

import jax
import jax.numpy as jnp
from jax.experimental import pallas as pl
from jax.experimental.pallas import tpu as pltpu

N_IN_HID1 = 128    # fc1 out
N_HID2 = 64        # fc2 out
N_OUT = 2          # real logit count per branch
N_OUT_PAD = 128    # lane-dense packed output width (branch1 -> lanes 0:2, branch2 -> lanes 2:4)


def _round_up(x, m):
    return ((x + m - 1) // m) * m


def _siamese_kernel(x1_ref, x2_ref, w1_ref, b1_ref, w2_ref, b2_ref,
                    w3a_ref, w3b_ref, b3_ref, o_ref, xs_ref):
    tb = x1_ref.shape[0]

    # Stack both branches along the sublane axis so fc1/fc2 weights are pushed to the MXU
    # once per layer (instead of once per branch).  tb is a multiple of 16 for B > 16, so
    # the bf16 packed-sublane store at offset tb stays vreg-aligned.
    xs_ref[pl.ds(0, tb), :] = x1_ref[...].astype(jnp.bfloat16)
    xs_ref[pl.ds(tb, tb), :] = x2_ref[...].astype(jnp.bfloat16)
    x = xs_ref[...]

    # fc1 / fc2: bf16 operands, f32 accumulation; bias-add + ReLU kept in f32 (v5e-friendly).
    h1 = jnp.dot(x, w1_ref[...], preferred_element_type=jnp.float32) + b1_ref[...]
    h1 = jnp.maximum(h1, 0.0).astype(jnp.bfloat16)
    h2 = jnp.dot(h1, w2_ref[...], preferred_element_type=jnp.float32) + b2_ref[...]
    h2 = jnp.maximum(h2, 0.0).astype(jnp.bfloat16)

    # fc3: branch-1 logits land in lanes 0:2 (w3a), branch-2 logits in lanes 2:4 (w3b);
    # total MXU FLOPs are identical to one fused (2*tb,64)@(64,128) matmul, but the result
    # is a single packed, lane-dense (tb, 128) tile -> one bf16 store per grid step.
    packed = (jnp.dot(h2[:tb], w3a_ref[...], preferred_element_type=jnp.float32)
              + jnp.dot(h2[tb:], w3b_ref[...], preferred_element_type=jnp.float32)
              + b3_ref[...])
    o_ref[...] = packed.astype(o_ref.dtype)


@partial(jax.jit, static_argnames=("tb_max",))
def siamese_forward_pallas(vec1, vec2, params, *, tb_max=1024):
    """Both Siamese branches in one pallas_call. Returns (out1, out2), each (B, 2) float32."""
    w1, b1, w2, b2, w3a, w3b, b3p = params
    B, K = vec1.shape

    # ---- batch tile selection ----
    # Per-row pipelined VMEM footprint: 2 input tiles x 2 buffers (f32), stacked bf16 scratch,
    # double-buffered bf16 output tile, plus f32/bf16 intermediates of the matmul chain.
    bytes_per_row = (2 * 2 * K * 4          # x1/x2 double-buffered f32 tiles
                     + 2 * K * 2            # stacked bf16 scratch
                     + 2 * N_OUT_PAD * 2    # double-buffered bf16 output tile
                     + 2 * (N_IN_HID1 * 6 + N_HID2 * 6))  # h1/h2/packed temporaries
    weight_bytes = sum(int(p.size) * p.dtype.itemsize for p in params)
    vmem_budget = 20 * 1024 * 1024 - 2 * weight_bytes
    tb_cap = max(16, (max(vmem_budget, 0) // bytes_per_row) // 16 * 16)

    if B <= 16:
        tb = B  # single block equal to the full batch dim (always a legal block shape)
    else:
        # Multiple of 16 (bf16 sublane alignment), >= 2 grid steps so both v7x TCs get work,
        # capped by tb_max and the K-dependent VMEM budget (v7x has only 64 MiB VMEM).
        tb = min(_round_up(pl.cdiv(B, 2), 16), tb_max, tb_cap)
    grid = (pl.cdiv(B, tb),)

    x_spec = pl.BlockSpec((tb, K), lambda i: (i, 0))
    o_spec = pl.BlockSpec((tb, N_OUT_PAD), lambda i: (i, 0))
    # Constant index_map -> block index never changes -> DMA'd once, stays VMEM-resident.
    resident = lambda a: pl.BlockSpec(a.shape, lambda i, nd=a.ndim: (0,) * nd)

    cost = pl.CostEstimate(
        flops=2 * 2 * B * (K * N_IN_HID1 + N_IN_HID1 * N_HID2 + N_HID2 * N_OUT_PAD),
        transcendentals=0,
        bytes_accessed=(2 * B * K * vec1.dtype.itemsize
                        + weight_bytes
                        + B * N_OUT_PAD * 2),  # single packed bf16 output
    )

    packed = pl.pallas_call(
        _siamese_kernel,
        grid=grid,
        in_specs=[x_spec, x_spec,
                  resident(w1), resident(b1),
                  resident(w2), resident(b2),
                  resident(w3a), resident(w3b), resident(b3p)],
        out_specs=o_spec,
        out_shape=jax.ShapeDtypeStruct((B, N_OUT_PAD), jnp.bfloat16),
        scratch_shapes=[pltpu.VMEM((2 * tb, K), jnp.bfloat16)],
        compiler_params=pltpu.CompilerParams(
            dimension_semantics=("parallel",),
            vmem_limit_bytes=32 * 1024 * 1024),
        cost_estimate=cost,
    )(vec1, vec2, w1, b1, w2, b2, w3a, w3b, b3p)

    # Branch-1 logits are lanes 0:2, branch-2 logits are lanes 2:4 of the packed tile.
    # The wrapper is jitted, so these tiny slices fuse instead of re-reading (B,128) from HBM.
    out1 = packed[:, 0:N_OUT].astype(jnp.float32)
    out2 = packed[:, N_OUT:2 * N_OUT].astype(jnp.float32)
    return out1, out2


class SiameseNetworkPallas:
    """Pallas/TPU implementation of SiameseNetwork.forward (shared-weight MLP branches)."""

    def __init__(self, n_classes, key):
        ks = jax.random.split(key, 6)

        # PyTorch nn.Linear-style uniform init with fan-in bound; weights stored as
        # (in_features, out_features) so the kernel computes x @ W + b.
        def lin(kw, kb, fan_in, fan_out):
            bound = 1.0 / float(fan_in) ** 0.5
            w = jax.random.uniform(kw, (fan_in, fan_out), jnp.float32, -bound, bound)
            b = jax.random.uniform(kb, (1, fan_out), jnp.float32, -bound, bound)
            return w, b

        w1, b1 = lin(ks[0], ks[1], n_classes, N_IN_HID1)
        w2, b2 = lin(ks[2], ks[3], N_IN_HID1, N_HID2)
        w3, b3 = lin(ks[4], ks[5], N_HID2, N_OUT)

        # Two zero-padded copies of the final (64 -> 2) layer: branch-1 logits land in
        # lanes 0:2, branch-2 logits in lanes 2:4 of the packed 128-lane output.
        w3a = jnp.zeros((N_HID2, N_OUT_PAD), jnp.float32).at[:, 0:N_OUT].set(w3)
        w3b = jnp.zeros((N_HID2, N_OUT_PAD), jnp.float32).at[:, N_OUT:2 * N_OUT].set(w3)
        b3p = (jnp.zeros((1, N_OUT_PAD), jnp.float32)
               .at[:, 0:N_OUT].set(b3)
               .at[:, N_OUT:2 * N_OUT].set(b3))

        # Weights cast to bf16 once (MXU-native); biases stay f32 (added to f32 accumulators).
        self.params = (w1.astype(jnp.bfloat16), b1,
                       w2.astype(jnp.bfloat16), b2,
                       w3a.astype(jnp.bfloat16), w3b.astype(jnp.bfloat16), b3p)

    def forward(self, vec1, vec2):
        return siamese_forward_pallas(vec1, vec2, self.params)


def _reference_forward(vec1, vec2, params):
    """Pure-JAX reference with the same bf16-operand / f32-accumulate math as the kernel."""
    w1, b1, w2, b2, w3a, w3b, b3p = params
    w3 = w3a[:, 0:N_OUT]
    b3 = b3p[:, 0:N_OUT]

    def once(x):
        x = x.astype(jnp.bfloat16)
        h1 = jnp.maximum(jnp.dot(x, w1, preferred_element_type=jnp.float32) + b1, 0.0)
        h1 = h1.astype(jnp.bfloat16)
        h2 = jnp.maximum(jnp.dot(h1, w2, preferred_element_type=jnp.float32) + b2, 0.0)
        h2 = h2.astype(jnp.bfloat16)
        return jnp.dot(h2, w3, preferred_element_type=jnp.float32) + b3

    return once(vec1), once(vec2)


if __name__ == "__main__":
    key = jax.random.PRNGKey(0)
    k_model, k1, k2 = jax.random.split(key, 3)

    n_classes = 32
    batch = 2
    vec1 = jax.random.normal(k1, (batch, n_classes), jnp.float32)
    vec2 = jax.random.normal(k2, (batch, n_classes), jnp.float32)

    net = SiameseNetworkPallas(n_classes, k_model)
    out1, out2 = net.forward(vec1, vec2)
    out1 = jax.block_until_ready(out1)
    out2 = jax.block_until_ready(out2)

    ref1, ref2 = _reference_forward(vec1, vec2, net.params)
    assert out1.shape == (batch, N_OUT) and out2.shape == (batch, N_OUT)
    # Kernel stores the packed logits in bf16, so compare at bf16-level tolerance.
    assert jnp.allclose(out1, ref1, atol=1e-2, rtol=1e-2)
    assert jnp.allclose(out2, ref2, atol=1e-2, rtol=1e-2)

    print("KERNEL_OK")
</pallas_src>

<mosaic_0001>
module attributes {stable_mosaic.version = 11 : i64} {
  func.func @_siamese_kernel(%arg0: i32, %arg1: memref<2x32xf32, #tpu.memory_space<vmem>>, %arg2: memref<2x32xf32, #tpu.memory_space<vmem>>, %arg3: memref<32x128xbf16, #tpu.memory_space<vmem>>, %arg4: memref<1x128xf32, #tpu.memory_space<vmem>>, %arg5: memref<128x64xbf16, #tpu.memory_space<vmem>>, %arg6: memref<1x64xf32, #tpu.memory_space<vmem>>, %arg7: memref<64x128xbf16, #tpu.memory_space<vmem>>, %arg8: memref<64x128xbf16, #tpu.memory_space<vmem>>, %arg9: memref<1x128xf32, #tpu.memory_space<vmem>>, %arg10: memref<2x128xbf16, #tpu.memory_space<vmem>>, %arg11: memref<4x32xbf16, #tpu.memory_space<vmem>>) attributes {dimension_semantics = [#tpu.dimension_semantics<parallel>], iteration_bounds = array<i64: 1>, scalar_prefetch = 0 : i64, scratch_operands = 1 : i64, tpu.core_type = #tpu.core_type<tc>, window_params = [{transform_indices = @transform_0, window_bounds = array<i64: 2, 32>}, {transform_indices = @transform_1, window_bounds = array<i64: 2, 32>}, {pipeline_mode = #tpu.pipeline_mode<synchronous>, transform_indices = @transform_2, window_bounds = array<i64: 32, 128>}, {pipeline_mode = #tpu.pipeline_mode<synchronous>, transform_indices = @transform_3, window_bounds = array<i64: 1, 128>}, {pipeline_mode = #tpu.pipeline_mode<synchronous>, transform_indices = @transform_4, window_bounds = array<i64: 128, 64>}, {pipeline_mode = #tpu.pipeline_mode<synchronous>, transform_indices = @transform_5, window_bounds = array<i64: 1, 64>}, {pipeline_mode = #tpu.pipeline_mode<synchronous>, transform_indices = @transform_6, window_bounds = array<i64: 64, 128>}, {pipeline_mode = #tpu.pipeline_mode<synchronous>, transform_indices = @transform_7, window_bounds = array<i64: 64, 128>}, {pipeline_mode = #tpu.pipeline_mode<synchronous>, transform_indices = @transform_8, window_bounds = array<i64: 1, 128>}, {transform_indices = @transform_9, window_bounds = array<i64: 2, 128>}]} {
    %c0 = arith.constant 0 : index
    %c0_0 = arith.constant 0 : index
    %0 = vector.load %arg1[%c0, %c0_0] : memref<2x32xf32, #tpu.memory_space<vmem>>, vector<2x32xf32>
    %1 = arith.truncf %0 : vector<2x32xf32> to vector<2x32xbf16>
    %c0_1 = arith.constant 0 : index
    %c0_2 = arith.constant 0 : index
    %2 = vector.load %arg11[%c0_1, %c0_2] : memref<4x32xbf16, #tpu.memory_space<vmem>>, vector<2x32xbf16>
    tpu.vector_store %arg11[%c0_1, %c0_2], %1 {strides = array<i32>} : memref<4x32xbf16, #tpu.memory_space<vmem>>, vector<2x32xbf16>,
    %c0_3 = arith.constant 0 : index
    %c0_4 = arith.constant 0 : index
    %3 = vector.load %arg2[%c0_3, %c0_4] : memref<2x32xf32, #tpu.memory_space<vmem>>, vector<2x32xf32>
    %4 = arith.truncf %3 : vector<2x32xf32> to vector<2x32xbf16>
    %c2 = arith.constant 2 : index
    %c0_5 = arith.constant 0 : index
    %5 = vector.load %arg11[%c2, %c0_5] : memref<4x32xbf16, #tpu.memory_space<vmem>>, vector<2x32xbf16>
    tpu.vector_store %arg11[%c2, %c0_5], %4 {strides = array<i32>} : memref<4x32xbf16, #tpu.memory_space<vmem>>, vector<2x32xbf16>,
    %c0_6 = arith.constant 0 : index
    %c0_7 = arith.constant 0 : index
    %6 = vector.load %arg11[%c0_6, %c0_7] : memref<4x32xbf16, #tpu.memory_space<vmem>>, vector<4x32xbf16>
    %c0_8 = arith.constant 0 : index
    %c0_9 = arith.constant 0 : index
    %7 = vector.load %arg3[%c0_8, %c0_9] : memref<32x128xbf16, #tpu.memory_space<vmem>>, vector<32x128xbf16>
    %cst = arith.constant dense<0.000000e+00> : vector<4x128xf32>
    %8 = tpu.matmul %6, %7, %cst {dimension_numbers = #tpu.dot_dimension_numbers<[1], [0], [0], [1], [0, 0, 1, 1], [], []>} : vector<4x32xbf16>, vector<32x128xbf16>, vector<4x128xf32> -> vector<4x128xf32>
    %c0_10 = arith.constant 0 : index
    %c0_11 = arith.constant 0 : index
    %9 = vector.load %arg4[%c0_10, %c0_11] : memref<1x128xf32, #tpu.memory_space<vmem>>, vector<1x128xf32>
    %10 = vector.broadcast %9 : vector<1x128xf32> to vector<4x128xf32>
    %11 = arith.addf %8, %10 : vector<4x128xf32>
    %cst_12 = arith.constant 0.000000e+00 : f32
    %12 = vector.broadcast %cst_12 : f32 to vector<4x128xf32>
    %13 = arith.maximumf %11, %12 : vector<4x128xf32>
    %14 = arith.truncf %13 : vector<4x128xf32> to vector<4x128xbf16>
    %c0_13 = arith.constant 0 : index
    %c0_14 = arith.constant 0 : index
    %15 = vector.load %arg5[%c0_13, %c0_14] : memref<128x64xbf16, #tpu.memory_space<vmem>>, vector<128x64xbf16>
    %cst_15 = arith.constant dense<0.000000e+00> : vector<4x64xf32>
    %16 = tpu.matmul %14, %15, %cst_15 {dimension_numbers = #tpu.dot_dimension_numbers<[1], [0], [0], [1], [0, 0, 1, 1], [], []>} : vector<4x128xbf16>, vector<128x64xbf16>, vector<4x64xf32> -> vector<4x64xf32>
    %c0_16 = arith.constant 0 : index
    %c0_17 = arith.constant 0 : index
    %17 = vector.load %arg6[%c0_16, %c0_17] : memref<1x64xf32, #tpu.memory_space<vmem>>, vector<1x64xf32>
    %18 = vector.broadcast %17 : vector<1x64xf32> to vector<4x64xf32>
    %19 = arith.addf %16, %18 : vector<4x64xf32>
    %cst_18 = arith.constant 0.000000e+00 : f32
    %20 = vector.broadcast %cst_18 : f32 to vector<4x64xf32>
    %21 = arith.maximumf %19, %20 : vector<4x64xf32>
    %22 = arith.truncf %21 : vector<4x64xf32> to vector<4x64xbf16>
    %23 = vector.extract_strided_slice %22 {offsets = [0, 0], sizes = [2, 64], strides = [1, 1]} : vector<4x64xbf16> to vector<2x64xbf16>
    %c0_19 = arith.constant 0 : index
    %c0_20 = arith.constant 0 : index
    %24 = vector.load %arg7[%c0_19, %c0_20] : memref<64x128xbf16, #tpu.memory_space<vmem>>, vector<64x128xbf16>
    %cst_21 = arith.constant dense<0.000000e+00> : vector<2x128xf32>
    %25 = tpu.matmul %23, %24, %cst_21 {dimension_numbers = #tpu.dot_dimension_numbers<[1], [0], [0], [1], [0, 0, 1, 1], [], []>} : vector<2x64xbf16>, vector<64x128xbf16>, vector<2x128xf32> -> vector<2x128xf32>
    %26 = vector.extract_strided_slice %22 {offsets = [2, 0], sizes = [2, 64], strides = [1, 1]} : vector<4x64xbf16> to vector<2x64xbf16>
    %c0_22 = arith.constant 0 : index
    %c0_23 = arith.constant 0 : index
    %27 = vector.load %arg8[%c0_22, %c0_23] : memref<64x128xbf16, #tpu.memory_space<vmem>>, vector<64x128xbf16>
    %cst_24 = arith.constant dense<0.000000e+00> : vector<2x128xf32>
    %28 = tpu.matmul %26, %27, %cst_24 {dimension_numbers = #tpu.dot_dimension_numbers<[1], [0], [0], [1], [0, 0, 1, 1], [], []>} : vector<2x64xbf16>, vector<64x128xbf16>, vector<2x128xf32> -> vector<2x128xf32>
    %29 = arith.addf %25, %28 : vector<2x128xf32>
    %c0_25 = arith.constant 0 : index
    %c0_26 = arith.constant 0 : index
    %30 = vector.load %arg9[%c0_25, %c0_26] : memref<1x128xf32, #tpu.memory_space<vmem>>, vector<1x128xf32>
    %31 = vector.broadcast %30 : vector<1x128xf32> to vector<2x128xf32>
    %32 = arith.addf %29, %31 : vector<2x128xf32>
    %33 = arith.truncf %32 : vector<2x128xf32> to vector<2x128xbf16>
    %c0_27 = arith.constant 0 : index
    %c0_28 = arith.constant 0 : index
    %34 = vector.load %arg10[%c0_27, %c0_28] : memref<2x128xbf16, #tpu.memory_space<vmem>>, vector<2x128xbf16>
    tpu.vector_store %arg10[%c0_27, %c0_28], %33 {strides = array<i32>} : memref<2x128xbf16, #tpu.memory_space<vmem>>, vector<2x128xbf16>,
    return
  }
  func.func @transform_0(%arg0: i32) -> (i32, i32) {
    %c0_i32 = arith.constant 0 : i32
    %c0_i32_0 = arith.constant 0 : i32
    return %arg0, %c0_i32 : i32, i32
  }
  func.func @transform_1(%arg0: i32) -> (i32, i32) {
    %c0_i32 = arith.constant 0 : i32
    %c0_i32_0 = arith.constant 0 : i32
    return %arg0, %c0_i32 : i32, i32
  }
  func.func @transform_2(%arg0: i32) -> (i32, i32) {
    %c0_i32 = arith.constant 0 : i32
    %c0_i32_0 = arith.constant 0 : i32
    %c0_i32_1 = arith.constant 0 : i32
    return %c0_i32, %c0_i32_0 : i32, i32
  }
  func.func @transform_3(%arg0: i32) -> (i32, i32) {
    %c0_i32 = arith.constant 0 : i32
    %c0_i32_0 = arith.constant 0 : i32
    %c0_i32_1 = arith.constant 0 : i32
    return %c0_i32, %c0_i32_0 : i32, i32
  }
  func.func @transform_4(%arg0: i32) -> (i32, i32) {
    %c0_i32 = arith.constant 0 : i32
    %c0_i32_0 = arith.constant 0 : i32
    %c0_i32_1 = arith.constant 0 : i32
    return %c0_i32, %c0_i32_0 : i32, i32
  }
  func.func @transform_5(%arg0: i32) -> (i32, i32) {
    %c0_i32 = arith.constant 0 : i32
    %c0_i32_0 = arith.constant 0 : i32
    %c0_i32_1 = arith.constant 0 : i32
    return %c0_i32, %c0_i32_0 : i32, i32
  }
  func.func @transform_6(%arg0: i32) -> (i32, i32) {
    %c0_i32 = arith.constant 0 : i32
    %c0_i32_0 = arith.constant 0 : i32
    %c0_i32_1 = arith.constant 0 : i32
    return %c0_i32, %c0_i32_0 : i32, i32
  }
  func.func @transform_7(%arg0: i32) -> (i32, i32) {
    %c0_i32 = arith.constant 0 : i32
    %c0_i32_0 = arith.constant 0 : i32
    %c0_i32_1 = arith.constant 0 : i32
    return %c0_i32, %c0_i32_0 : i32, i32
  }
  func.func @transform_8(%arg0: i32) -> (i32, i32) {
    %c0_i32 = arith.constant 0 : i32
    %c0_i32_0 = arith.constant 0 : i32
    %c0_i32_1 = arith.constant 0 : i32
    return %c0_i32, %c0_i32_0 : i32, i32
  }
  func.func @transform_9(%arg0: i32) -> (i32, i32) {
    %c0_i32 = arith.constant 0 : i32
    %c0_i32_0 = arith.constant 0 : i32
    return %arg0, %c0_i32 : i32, i32
  }
}

</mosaic_0001>

<bundles_post_ra>
// kernel: siamese_forward_pallas.1
= control target key start
LH: loop header
LB: loop body
LE: loop exit
PB: predicated region body
PF: predicated region fallthrough
CT: control target
= control target key end

     0   :  { %v520_v0 = vmov 0.0   ;;  %vm521_vm0 = vmmov 0   ;;  %v522_v2 = vmov 1983009808   ;;  %v43_v4 = vlaneseq  ;;  %s671_s2 = inlined_call_operand.vmem [shape: bf16[32,128], index: 2, kind: input, shape index: {}]   ;;  %s672_s0 = inlined_call_operand.vmem [shape: f32[2,32], index: 0, kind: input, shape index: {}]   ;;  %s673_s1 = inlined_call_operand.vmem [shape: f32[2,32], index: 1, kind: input, shape index: {}]   ;;  %s674_s4 = inlined_call_operand.vmem [shape: bf16[128,64], index: 4, kind: input, shape index: {}]   ;;  %s675_s7 = inlined_call_operand.vmem [shape: bf16[64,128], index: 7, kind: input, shape index: {}]   ;;  %s676_s3 = inlined_call_operand.vmem [shape: f32[1,128], index: 3, kind: input, shape index: {}]   ;;  %s677_s6 = inlined_call_operand.vmem [shape: bf16[64,128], index: 6, kind: input, shape index: {}]   ;;  %s678_s5 = inlined_call_operand.vmem [shape: f32[1,64], index: 5, kind: input, shape index: {}]   ;;  %s679_s8 = inlined_call_operand.vmem [shape: f32[1,128], index: 8, kind: input, shape index: {}]   ;;  %s680_s9 = inlined_call_operand.vmem [shape: bf16[2,128], index: 9, kind: output, shape index: {}]  }
   0x1   :  { %447 = vmatprep.subr.bf16.mxu0 %v520_v0  ;;  %v502_v1 = vld [vmem:[%s671_s2 + $0x8] sm:$0xff]   ;;  %451 = vmatprep.mubr.msk.bf16.mxu0 %vm521_vm0, %v520_v0  ;;  %v41_v3 = vunpack.c.l.s4 %v522_v2  ;;  %v503_v5 = vld [vmem:[%s671_s2] sm:$0xff]   ;;  %vm35_vm1 = vcmask 253952   ;;  %v504_v10 = vld [vmem:[%s674_s4 + $0x38] sm:$0xff]   ;;  %vm49_vm2 = vcmask 254977   ;;  %vm75_vm3 = vcmask 261120  }
   0x2   :  { %455 = vmatprep.subr.bf16.mxu1 %v520_v0  ;;  %471 = vmatprep.mubr.msk.bf16.mxu1 %vm521_vm0, %v520_v0  ;;  %v33_v6 = vld [vmem:[%s672_s0] sm:$0x3]  ;;  %v44_v9 = vshrl.u32 %v43_v4, 7  ;;  %v505_v14 = vld [vmem:[%s674_s4 + $0x30] sm:$0xff]   ;;  %v506_v17 = vld [vmem:[%s674_s4 + $0x28] sm:$0xff]   ;;  %vm276_vm4 = vcmask 523264  }
   0x3   :  { %448 = vmatpush3.bf16.msra.mxu0 %v502_v1  ;;  %v37_v7 = vld [vmem:[%s673_s1] sm:$0x3]  ;;  %v42_v8 = vunpack.c.0.s8 %v41_v3  ;;  %v34_v11 = vpack.c.bf16 %v33_v6, %v33_v6  ;;  %456 = vmatpush3.bf16.msra.mxu1 %v504_v10  ;;  %v508_v19 = vld [vmem:[%s674_s4 + $0x18] sm:$0xff]   ;;  %v509_v21 = vld [vmem:[%s674_s4 + $0x10] sm:$0xff]  }
   0x4   :  { %449 = vmatprep.subr.bf16.mxu0 %v520_v0  ;;  %v38_v12 = vpack.c.bf16 %v37_v7, %v37_v7  ;;  %457 = vmatprep.subr.bf16.mxu1 %v520_v0  ;;  %v507_v18 = vld [vmem:[%s674_s4 + $0x20] sm:$0xff]   ;;  %v510_v22 = vld [vmem:[%s674_s4 + $0x8] sm:$0xff]   ;;  %v512_v24 = vld [vmem:[%s675_s7 + $0x18] sm:$0xff]  }
   0x5   :  { %v45_v13 = vsub.s32 %v42_v8, %v44_v9  ;;  %36 = vst.msk [vmem:[#allocation2] sm:$0x1] %vm35_vm1, %v34_v11  ;;  %v511_v23 = vld [vmem:[%s674_s4] sm:$0xff]   ;;  %v513_v25 = vld [vmem:[%s675_s7 + $0x10] sm:$0xff]   ;;  %v514_v34 = vld [vmem:[%s675_s7 + $0x8] sm:$0xff]  }
   0x6   :  { %v401_v26 = vld [vmem:[%s676_s3] ss:$0 sm:$0xff]  ;;  %v516_v44 = vld [vmem:[%s677_s6 + $0x18] sm:$0xff]   ;;  %v517_v46 = vld [vmem:[%s677_s6 + $0x10] sm:$0xff]  }
   0x7   :  { %450 = vmatpush3.bf16.msra.mxu0 %v503_v5  ;;  %v46_v15 = vrot.slane %v38_v12, %v45_v13  ;;  %458 = vmatpush3.bf16.msra.mxu1 %v505_v14  ;;  %v515_v35 = vld [vmem:[%s675_s7] sm:$0xff]   ;;  %v518_v47 = vld [vmem:[%s677_s6 + $0x8] sm:$0xff]  }
   0x8   :  { %475 = vmatprep.subr.bf16.mxu0 %v520_v0  ;;  %459 = vmatprep.subr.bf16.mxu1 %v520_v0  ;;  %v405_v36 = vld [vmem:[%s678_s5] ss:$0 sm:$0xff] }
   0x9   :  { %v47_v16 = vrot.slane %v46_v15, 7  ;;  %v519_v48 = vld [vmem:[%s677_s6] sm:$0xff]  }
   0xa   :  { %v424_v54 = vld [vmem:[%s679_s8] ss:$0 sm:$0xff] }
   0xb   :  { %50 = vst.msk [vmem:[#allocation2] sm:$0x2] %vm49_vm2, %v47_v16  ;;  %460 = vmatpush3.bf16.msra.mxu1 %v506_v17 }
   0xc   :  { %461 = vmatprep.subr.bf16.mxu1 %v520_v0 }
   0xf   :  { %462 = vmatpush3.bf16.msra.mxu1 %v507_v18 }
  0x10   :  { %463 = vmatprep.subr.bf16.mxu1 %v520_v0 }
  0x12   :  { %v51_v20 = vld [vmem:[#allocation2] sm:$0x3] }
  0x13   :  { %452 = vmatmul.mubr.msk.bf16.vlgmr.msra.gmra.mxu0 %vm75_vm3, %v51_v20  ;;  %464 = vmatpush3.bf16.msra.mxu1 %v508_v19 }
  0x14   :  { %483 = vmatprep.mubr.msk.bf16.mxu0 %vm521_vm0, %v520_v0  ;;  %465 = vmatprep.subr.bf16.mxu1 %v520_v0 }
  0x15   :  { %476 = vmatpush3.bf16.msra.mxu0 %v512_v24 }
  0x16   :  { %477 = vmatprep.subr.bf16.mxu0 %v520_v0 }
  0x17   :  { %466 = vmatpush3.bf16.msra.mxu1 %v509_v21 }
  0x18   :  { %467 = vmatprep.subr.bf16.mxu1 %v520_v0 }
  0x19   :  { %478 = vmatpush3.bf16.msra.mxu0 %v513_v25 }
  0x1a   :  { %479 = vmatprep.subr.bf16.mxu0 %v520_v0 }
  0x1b   :  { %468 = vmatpush3.bf16.msra.mxu1 %v510_v22 }
  0x1c   :  { %469 = vmatprep.subr.bf16.mxu1 %v520_v0 }
  0x1d   :  { %480 = vmatpush3.bf16.msra.mxu0 %v514_v34 }
  0x1e   :  { %481 = vmatprep.subr.bf16.mxu0 %v520_v0 }
  0x1f   :  { %470 = vmatpush3.bf16.msra.mxu1 %v511_v23 }
  0x21   :  { %482 = vmatpush3.bf16.msra.mxu0 %v515_v35 }
  0x22   :  { %487 = vmatprep.subr.bf16.mxu0 %v520_v0 }
  0xd3   :  { %v113_v27 = vpop.f32.mrf.mxu0 }
  0xd4   :  { %v114_v28 = vadd.f32 %v401_v26, %v113_v27 }
  0xd5   :  { %v453_v29 = vpop.f32.mrf.mxu0 }
  0xd6   :  { %v119_v30 = vmax.f32 %v114_v28, 0.0 }
  0xd7   :  { %v116_v31 = vpop.f32.mrf.mxu0 }
  0xd8   :  { %v120_v32 = vpack.c.bf16 %v119_v30, %v119_v30 }
  0xd9   :  { %v454_v33 = vpop.f32.mrf.mxu0 }
  0xda   :  { %472 = vmatmul.mubr.bf16.vlgmr.msra.gmra.mxu1 %v120_v32 }
 0x19a   :  { %v226_v37 = vpop.f32.mrf.mxu1 }
 0x19b   :  { %v227_v38 = vadd.f32 %v405_v36, %v226_v37 }
 0x19c   :  { %v473_v39 = vpop.f32.mrf.mxu1 }
 0x19d   :  { %v232_v40 = vmax.f32 %v227_v38, 0.0 }
 0x19e   :  { %v229_v41 = vpop.f32.mrf.mxu1 }
 0x19f   :  { %v233_v42 = vpack.c.bf16 %v232_v40, %v232_v40 }
 0x1a0   :  { %v474_v43 = vpop.f32.mrf.mxu1 }
 0x1a1   :  { %v251_v45 = vrot.slane %v233_v42, 1 }
 0x1a3   :  { %484 = vmatmul.mubr.msk.bf16.vlgmr.msra.gmra.mxu0 %vm276_vm4, %v251_v45 }
 0x1a4   :  { %488 = vmatpush3.bf16.msra.mxu0 %v516_v44  ;;  %495 = vmatprep.mubr.msk.bf16.mxu0 %vm521_vm0, %v520_v0 }
 0x1a5   :  { %489 = vmatprep.subr.bf16.mxu0 %v520_v0 }
 0x1a8   :  { %490 = vmatpush3.bf16.msra.mxu0 %v517_v46 }
 0x1a9   :  { %491 = vmatprep.subr.bf16.mxu0 %v520_v0 }
 0x1ac   :  { %492 = vmatpush3.bf16.msra.mxu0 %v518_v47 }
 0x1ad   :  { %493 = vmatprep.subr.bf16.mxu0 %v520_v0 }
 0x1b0   :  { %494 = vmatpush3.bf16.msra.mxu0 %v519_v48 }
 0x1b3   :  { %496 = vmatmul.mubr.msk.bf16.vlgmr.msra.gmra.mxu0 %vm276_vm4, %v233_v42 }
 0x263   :  { %v314_v49 = vpop.f32.mrf.mxu0 }
 0x265   :  { %v485_v50 = vpop.f32.mrf.mxu0 }
 0x267   :  { %v317_v51 = vpop.f32.mrf.mxu0 }
 0x269   :  { %v486_v52 = vpop.f32.mrf.mxu0 }
 0x273   :  { %v381_v53 = vpop.f32.mrf.mxu0 }
 0x274   :  { %v382_v55 = vadd.f32 %v381_v53, %v314_v49 }
 0x275   :  { %v497_v56 = vpop.f32.mrf.mxu0 }
 0x276   :  { %v394_v57 = vadd.f32 %v424_v54, %v382_v55 }
 0x277   :  { %v384_v58 = vpop.f32.mrf.mxu0 }
 0x278   :  { %v395_v59 = vpack.c.bf16 %v394_v57, %v394_v57 }
 0x279   :  { %v498_v60 = vpop.f32.mrf.mxu0 }
 0x27a   :  { %396 = vst [vmem:[%s680_s9] sm:$0x1] %v395_v59 }

</bundles_post_ra>
